<compile_context>
chip_gen: v6e
topology: v6e:2x2x1
jax: 0.10.0
libtpu: 0.0.40
codegen_flags: <defaults>
</compile_context>

<pallas_src>
import functools
import math

import jax
import jax.numpy as jnp
from jax.experimental import pallas as pl
from jax.experimental.pallas import tpu as pltpu


def self_attention_kernel(x_ref, wqkv_ref, bqkv_ref, wp_ref, bp_ref, o_ref,
                          y_ref, *, num_heads, head_dim, embed_dim):
    """One grid step = one batch element.

    x_ref    : (T, C)    bf16   activations for this batch element
    wqkv_ref : (C, 3C)   bf16   [Wq*scale | Wk | Wv], head-major columns
    bqkv_ref : (1, 3C)   f32    [bq*scale | bk | bv]
    wp_ref   : (C, Cp)   bf16   output projection (lane-padded)
    bp_ref   : (1, Cp)   f32    output bias (lane-padded)
    o_ref    : (T, Cp)   bf16
    y_ref    : (T, C)    bf16   scratch: per-head contexts in (h e) order
    """
    H, hd, C = num_heads, head_dim, embed_dim

    x = x_ref[...]                                                 # (T, C) bf16

    # Fused QKV projection: one MXU matmul (N = 3C), f32 accumulate + f32 bias.
    qkv = jnp.dot(x, wqkv_ref[...],
                  preferred_element_type=jnp.float32) + bqkv_ref[...]  # (T, 3C)
    qkv = qkv.astype(jnp.bfloat16)

    # Unrolled static loop over heads (H is a small Python int).
    for h in range(H):
        q_h = qkv[:, 0 * C + h * hd: 0 * C + (h + 1) * hd]        # (T, hd)
        k_h = qkv[:, 1 * C + h * hd: 1 * C + (h + 1) * hd]
        v_h = qkv[:, 2 * C + h * hd: 2 * C + (h + 1) * hd]

        # Scores (scale already folded into Wq/bq); softmax math in f32.
        s = jnp.einsum('qd,kd->qk', q_h, k_h,
                       preferred_element_type=jnp.float32)         # (T, T)
        s = s - jnp.max(s, axis=-1, keepdims=True)
        p = jnp.exp(s)
        l = jnp.sum(p, axis=-1, keepdims=True)                     # (T, 1)

        # Unnormalized PV, then deferred EXACT normalization on the small
        # (T, hd) context instead of the (T, T) probability slab.
        ctx = jnp.dot(p.astype(jnp.bfloat16), v_h,
                      preferred_element_type=jnp.float32)           # (T, hd)
        ctx = ctx * (1.0 / l)

        # Assemble heads in torch's 'b h t e -> b t (h e)' channel order.
        y_ref[:, h * hd:(h + 1) * hd] = ctx.astype(jnp.bfloat16)

    # Single head-contracted output projection (K = C) + bias; bf16 store.
    out = jnp.dot(y_ref[...], wp_ref[...],
                  preferred_element_type=jnp.float32) + bp_ref[...]  # (T, Cp)
    o_ref[...] = out.astype(o_ref.dtype)


def self_attention(x, params, num_heads):
    """x: (B, T, C) f32. params: (C, C) weights in (in, out) layout, (C,) biases.

    (nn.Linear weights from torch would be transposed to (in, out) first.)
    Returns (B, T, C) bf16 (downstream transformer blocks consume bf16).
    """
    B, T, C = x.shape
    H = num_heads
    assert C % H == 0
    hd = C // H
    Cp = ((C + 127) // 128) * 128            # lane-dense output width
    bf16, f32 = jnp.bfloat16, jnp.float32
    scale = 1.0 / math.sqrt(hd)

    # ---- wrapper-side layout prep (free): keeps the kernel reshape-free ----
    # Scale folded into Wq / bq; columns stay in torch's head-major order.
    wqkv = jnp.concatenate([params["wq"] * scale, params["wk"], params["wv"]],
                           axis=1).astype(bf16)                      # (C, 3C)
    bqkv = jnp.concatenate([params["bq"] * scale, params["bk"], params["bv"]],
                           axis=0).reshape(1, 3 * C).astype(f32)     # (1, 3C)
    wp = jnp.pad(params["wp"], ((0, 0), (0, Cp - C))).astype(bf16)   # (C, Cp)
    bp = jnp.pad(params["bp"], (0, Cp - C)).reshape(1, Cp).astype(f32)

    x_in = x.astype(bf16)

    kernel = functools.partial(self_attention_kernel,
                               num_heads=H, head_dim=hd, embed_dim=C)

    cost = pl.CostEstimate(
        flops=int(2 * B * T * C * 3 * C            # fused QKV
                  + 4 * B * H * T * T * hd         # QK^T + PV
                  + 2 * B * T * C * Cp),           # output projection
        transcendentals=int(B * H * T * T),
        bytes_accessed=int(x_in.size * 2 + wqkv.size * 2 + bqkv.size * 4
                           + wp.size * 2 + bp.size * 4 + B * T * Cp * 2))

    out = pl.pallas_call(
        kernel,
        out_shape=jax.ShapeDtypeStruct((B, T, Cp), bf16),
        grid=(B,),                                    # one step per batch elem
        in_specs=[
            pl.BlockSpec((None, T, C), lambda b: (b, 0, 0)),   # x: streams
            pl.BlockSpec((C, 3 * C), lambda b: (0, 0)),        # weights stay
            pl.BlockSpec((1, 3 * C), lambda b: (0, 0)),        #   resident
            pl.BlockSpec((C, Cp), lambda b: (0, 0)),
            pl.BlockSpec((1, Cp), lambda b: (0, 0)),
        ],
        out_specs=pl.BlockSpec((None, T, Cp), lambda b: (b, 0, 0)),
        scratch_shapes=[pltpu.VMEM((T, C), bf16)],
        compiler_params=pltpu.CompilerParams(
            dimension_semantics=("parallel",),        # megacore-shardable
            vmem_limit_bytes=64 * 1024 * 1024),
        cost_estimate=cost,
    )(x_in, wqkv, bqkv, wp, bp)

    return out[:, :, :C]


def _reference(x, params, num_heads, matmul_dtype=jnp.float32):
    """Pure-JAX mirror of torch SelfAttention.forward (eval mode).

    matmul_dtype=bfloat16 mirrors the kernel's MXU operand precision
    (f32 accumulation, f32 softmax) for a tight numerical check.
    """
    B, T, C = x.shape
    H = num_heads
    hd = C // H
    md = matmul_dtype

    def mm(a, b):
        return jnp.dot(a.astype(md), b.astype(md),
                       preferred_element_type=jnp.float32)

    xf = x.reshape(B * T, C)
    q = mm(xf, params["wq"]) + params["bq"]
    k = mm(xf, params["wk"]) + params["bk"]
    v = mm(xf, params["wv"]) + params["bv"]

    def heads(t):                                      # (BT, C) -> (B, H, T, hd)
        return t.reshape(B, T, H, hd).transpose(0, 2, 1, 3)

    qh, kh, vh = heads(q), heads(k), heads(v)
    att = jnp.einsum('bhqd,bhkd->bhqk', qh.astype(md), kh.astype(md),
                     preferred_element_type=jnp.float32) / math.sqrt(hd)
    att = jax.nn.softmax(att, axis=-1)
    y = jnp.einsum('bhqk,bhkd->bhqd', att.astype(md), vh.astype(md),
                   preferred_element_type=jnp.float32)
    y = y.transpose(0, 2, 1, 3).reshape(B * T, C)      # 'b h t e -> b t (h e)'
    out = mm(y, params["wp"]) + params["bp"]
    return out.reshape(B, T, C)


if __name__ == "__main__":
    # Shapes consistent with the config: embed_dim=32, num_heads=4, B=2, T=8.
    B, T, C, H = 2, 8, 32, 4

    key = jax.random.PRNGKey(0)
    ks = jax.random.split(key, 9)
    wscale = 1.0 / math.sqrt(C)
    params = {
        "wq": jax.random.normal(ks[0], (C, C), jnp.float32) * wscale,
        "bq": jax.random.normal(ks[1], (C,), jnp.float32) * 0.01,
        "wk": jax.random.normal(ks[2], (C, C), jnp.float32) * wscale,
        "bk": jax.random.normal(ks[3], (C,), jnp.float32) * 0.01,
        "wv": jax.random.normal(ks[4], (C, C), jnp.float32) * wscale,
        "bv": jax.random.normal(ks[5], (C,), jnp.float32) * 0.01,
        "wp": jax.random.normal(ks[6], (C, C), jnp.float32) * wscale,
        "bp": jax.random.normal(ks[7], (C,), jnp.float32) * 0.01,
    }
    x = jax.random.normal(ks[8], (B, T, C), jnp.float32)

    out = jax.block_until_ready(self_attention(x, params, H))
    assert out.shape == (B, T, C)
    out_f32 = out.astype(jnp.float32)

    # Tight check vs a reference mirroring the kernel's mixed precision
    # (tolerance includes the final bf16 output quantization).
    ref_bf16 = _reference(x, params, H, matmul_dtype=jnp.bfloat16)
    assert jnp.allclose(out_f32, ref_bf16, atol=3e-2, rtol=3e-2), \
        float(jnp.max(jnp.abs(out_f32 - ref_bf16)))

    # Loose sanity check vs pure-f32 torch-equivalent math (tolerance reflects
    # the intentional bf16 MXU operands and bf16 output).
    ref_f32 = _reference(x, params, H, matmul_dtype=jnp.float32)
    assert jnp.allclose(out_f32, ref_f32, atol=1e-1, rtol=1e-1), \
        float(jnp.max(jnp.abs(out_f32 - ref_f32)))

    print("KERNEL_OK")
</pallas_src>

<mosaic_0001>
module attributes {stable_mosaic.version = 11 : i64} {
  func.func @self_attention_kernel(%arg0: i32, %arg1: memref<1x8x32xbf16, #tpu.memory_space<vmem>>, %arg2: memref<32x96xbf16, #tpu.memory_space<vmem>>, %arg3: memref<1x96xf32, #tpu.memory_space<vmem>>, %arg4: memref<32x128xbf16, #tpu.memory_space<vmem>>, %arg5: memref<1x128xf32, #tpu.memory_space<vmem>>, %arg6: memref<1x8x128xbf16, #tpu.memory_space<vmem>>, %arg7: memref<8x32xbf16, #tpu.memory_space<vmem>>) attributes {dimension_semantics = [#tpu.dimension_semantics<parallel>], iteration_bounds = array<i64: 2>, scalar_prefetch = 0 : i64, scratch_operands = 1 : i64, tpu.core_type = #tpu.core_type<tc>, window_params = [{transform_indices = @transform_0, window_bounds = array<i64: 1, 8, 32>}, {pipeline_mode = #tpu.pipeline_mode<synchronous>, transform_indices = @transform_1, window_bounds = array<i64: 32, 96>}, {pipeline_mode = #tpu.pipeline_mode<synchronous>, transform_indices = @transform_2, window_bounds = array<i64: 1, 96>}, {pipeline_mode = #tpu.pipeline_mode<synchronous>, transform_indices = @transform_3, window_bounds = array<i64: 32, 128>}, {pipeline_mode = #tpu.pipeline_mode<synchronous>, transform_indices = @transform_4, window_bounds = array<i64: 1, 128>}, {transform_indices = @transform_5, window_bounds = array<i64: 1, 8, 128>}]} {
    %c0 = arith.constant 0 : index
    %c0_0 = arith.constant 0 : index
    %c0_1 = arith.constant 0 : index
    %0 = vector.load %arg1[%c0, %c0_0, %c0_1] : memref<1x8x32xbf16, #tpu.memory_space<vmem>>, vector<1x8x32xbf16>
    %1 = vector.shape_cast %0 : vector<1x8x32xbf16> to vector<8x32xbf16>
    %c0_2 = arith.constant 0 : index
    %c0_3 = arith.constant 0 : index
    %2 = vector.load %arg2[%c0_2, %c0_3] : memref<32x96xbf16, #tpu.memory_space<vmem>>, vector<32x96xbf16>
    %cst = arith.constant dense<0.000000e+00> : vector<8x96xf32>
    %3 = tpu.matmul %1, %2, %cst {dimension_numbers = #tpu.dot_dimension_numbers<[1], [0], [0], [1], [0, 0, 1, 1], [], []>} : vector<8x32xbf16>, vector<32x96xbf16>, vector<8x96xf32> -> vector<8x96xf32>
    %c0_4 = arith.constant 0 : index
    %c0_5 = arith.constant 0 : index
    %4 = vector.load %arg3[%c0_4, %c0_5] : memref<1x96xf32, #tpu.memory_space<vmem>>, vector<1x96xf32>
    %5 = vector.broadcast %4 : vector<1x96xf32> to vector<8x96xf32>
    %6 = arith.addf %3, %5 : vector<8x96xf32>
    %7 = arith.truncf %6 : vector<8x96xf32> to vector<8x96xbf16>
    %8 = vector.extract_strided_slice %7 {offsets = [0, 0], sizes = [8, 8], strides = [1, 1]} : vector<8x96xbf16> to vector<8x8xbf16>
    %9 = vector.extract_strided_slice %7 {offsets = [0, 32], sizes = [8, 8], strides = [1, 1]} : vector<8x96xbf16> to vector<8x8xbf16>
    %10 = vector.extract_strided_slice %7 {offsets = [0, 64], sizes = [8, 8], strides = [1, 1]} : vector<8x96xbf16> to vector<8x8xbf16>
    "tpu.trace_start"() <{level = 10 : i32, message = "qd,kd->qk"}> : () -> ()
    %cst_6 = arith.constant dense<0.000000e+00> : vector<8x8xf32>
    %11 = tpu.matmul %8, %9, %cst_6 {dimension_numbers = #tpu.dot_dimension_numbers<[1], [1], [0], [0], [0, 0, 1, 0], [], []>} : vector<8x8xbf16>, vector<8x8xbf16>, vector<8x8xf32> -> vector<8x8xf32>
    "tpu.trace_stop"() : () -> ()
    %cst_7 = arith.constant dense<0xFF800000> : vector<8xf32>
    %12 = vector.multi_reduction <maximumf>, %11, %cst_7 [1] : vector<8x8xf32> to vector<8xf32>
    %13 = vector.shape_cast %12 : vector<8xf32> to vector<8x1xf32>
    %14 = vector.broadcast %13 : vector<8x1xf32> to vector<8x8xf32>
    %15 = arith.subf %11, %14 : vector<8x8xf32>
    %16 = math.exp %15 : vector<8x8xf32>
    %cst_8 = arith.constant dense<0.000000e+00> : vector<8xf32>
    %17 = vector.multi_reduction <add>, %16, %cst_8 [1] : vector<8x8xf32> to vector<8xf32>
    %18 = vector.shape_cast %17 : vector<8xf32> to vector<8x1xf32>
    %19 = arith.truncf %16 : vector<8x8xf32> to vector<8x8xbf16>
    %cst_9 = arith.constant dense<0.000000e+00> : vector<8x8xf32>
    %20 = tpu.matmul %19, %10, %cst_9 {dimension_numbers = #tpu.dot_dimension_numbers<[1], [0], [0], [1], [0, 0, 1, 1], [], []>} : vector<8x8xbf16>, vector<8x8xbf16>, vector<8x8xf32> -> vector<8x8xf32>
    %cst_10 = arith.constant 1.000000e+00 : f32
    %21 = vector.broadcast %cst_10 : f32 to vector<8x1xf32>
    %22 = arith.divf %21, %18 : vector<8x1xf32>
    %23 = vector.broadcast %22 : vector<8x1xf32> to vector<8x8xf32>
    %24 = arith.mulf %20, %23 : vector<8x8xf32>
    %25 = arith.truncf %24 : vector<8x8xf32> to vector<8x8xbf16>
    %c0_11 = arith.constant 0 : index
    %c0_12 = arith.constant 0 : index
    %26 = vector.load %arg7[%c0_11, %c0_12] : memref<8x32xbf16, #tpu.memory_space<vmem>>, vector<8x8xbf16>
    tpu.vector_store %arg7[%c0_11, %c0_12], %25 {strides = array<i32>} : memref<8x32xbf16, #tpu.memory_space<vmem>>, vector<8x8xbf16>,
    %27 = vector.extract_strided_slice %7 {offsets = [0, 8], sizes = [8, 8], strides = [1, 1]} : vector<8x96xbf16> to vector<8x8xbf16>
    %28 = vector.extract_strided_slice %7 {offsets = [0, 40], sizes = [8, 8], strides = [1, 1]} : vector<8x96xbf16> to vector<8x8xbf16>
    %29 = vector.extract_strided_slice %7 {offsets = [0, 72], sizes = [8, 8], strides = [1, 1]} : vector<8x96xbf16> to vector<8x8xbf16>
    "tpu.trace_start"() <{level = 10 : i32, message = "qd,kd->qk"}> : () -> ()
    %cst_13 = arith.constant dense<0.000000e+00> : vector<8x8xf32>
    %30 = tpu.matmul %27, %28, %cst_13 {dimension_numbers = #tpu.dot_dimension_numbers<[1], [1], [0], [0], [0, 0, 1, 0], [], []>} : vector<8x8xbf16>, vector<8x8xbf16>, vector<8x8xf32> -> vector<8x8xf32>
    "tpu.trace_stop"() : () -> ()
    %cst_14 = arith.constant dense<0xFF800000> : vector<8xf32>
    %31 = vector.multi_reduction <maximumf>, %30, %cst_14 [1] : vector<8x8xf32> to vector<8xf32>
    %32 = vector.shape_cast %31 : vector<8xf32> to vector<8x1xf32>
    %33 = vector.broadcast %32 : vector<8x1xf32> to vector<8x8xf32>
    %34 = arith.subf %30, %33 : vector<8x8xf32>
    %35 = math.exp %34 : vector<8x8xf32>
    %cst_15 = arith.constant dense<0.000000e+00> : vector<8xf32>
    %36 = vector.multi_reduction <add>, %35, %cst_15 [1] : vector<8x8xf32> to vector<8xf32>
    %37 = vector.shape_cast %36 : vector<8xf32> to vector<8x1xf32>
    %38 = arith.truncf %35 : vector<8x8xf32> to vector<8x8xbf16>
    %cst_16 = arith.constant dense<0.000000e+00> : vector<8x8xf32>
    %39 = tpu.matmul %38, %29, %cst_16 {dimension_numbers = #tpu.dot_dimension_numbers<[1], [0], [0], [1], [0, 0, 1, 1], [], []>} : vector<8x8xbf16>, vector<8x8xbf16>, vector<8x8xf32> -> vector<8x8xf32>
    %cst_17 = arith.constant 1.000000e+00 : f32
    %40 = vector.broadcast %cst_17 : f32 to vector<8x1xf32>
    %41 = arith.divf %40, %37 : vector<8x1xf32>
    %42 = vector.broadcast %41 : vector<8x1xf32> to vector<8x8xf32>
    %43 = arith.mulf %39, %42 : vector<8x8xf32>
    %44 = arith.truncf %43 : vector<8x8xf32> to vector<8x8xbf16>
    %c0_18 = arith.constant 0 : index
    %c8 = arith.constant 8 : index
    %45 = vector.load %arg7[%c0_18, %c8] : memref<8x32xbf16, #tpu.memory_space<vmem>>, vector<8x8xbf16>
    tpu.vector_store %arg7[%c0_18, %c8], %44 {strides = array<i32>} : memref<8x32xbf16, #tpu.memory_space<vmem>>, vector<8x8xbf16>,
    %46 = vector.extract_strided_slice %7 {offsets = [0, 16], sizes = [8, 8], strides = [1, 1]} : vector<8x96xbf16> to vector<8x8xbf16>
    %47 = vector.extract_strided_slice %7 {offsets = [0, 48], sizes = [8, 8], strides = [1, 1]} : vector<8x96xbf16> to vector<8x8xbf16>
    %48 = vector.extract_strided_slice %7 {offsets = [0, 80], sizes = [8, 8], strides = [1, 1]} : vector<8x96xbf16> to vector<8x8xbf16>
    "tpu.trace_start"() <{level = 10 : i32, message = "qd,kd->qk"}> : () -> ()
    %cst_19 = arith.constant dense<0.000000e+00> : vector<8x8xf32>
    %49 = tpu.matmul %46, %47, %cst_19 {dimension_numbers = #tpu.dot_dimension_numbers<[1], [1], [0], [0], [0, 0, 1, 0], [], []>} : vector<8x8xbf16>, vector<8x8xbf16>, vector<8x8xf32> -> vector<8x8xf32>
    "tpu.trace_stop"() : () -> ()
    %cst_20 = arith.constant dense<0xFF800000> : vector<8xf32>
    %50 = vector.multi_reduction <maximumf>, %49, %cst_20 [1] : vector<8x8xf32> to vector<8xf32>
    %51 = vector.shape_cast %50 : vector<8xf32> to vector<8x1xf32>
    %52 = vector.broadcast %51 : vector<8x1xf32> to vector<8x8xf32>
    %53 = arith.subf %49, %52 : vector<8x8xf32>
    %54 = math.exp %53 : vector<8x8xf32>
    %cst_21 = arith.constant dense<0.000000e+00> : vector<8xf32>
    %55 = vector.multi_reduction <add>, %54, %cst_21 [1] : vector<8x8xf32> to vector<8xf32>
    %56 = vector.shape_cast %55 : vector<8xf32> to vector<8x1xf32>
    %57 = arith.truncf %54 : vector<8x8xf32> to vector<8x8xbf16>
    %cst_22 = arith.constant dense<0.000000e+00> : vector<8x8xf32>
    %58 = tpu.matmul %57, %48, %cst_22 {dimension_numbers = #tpu.dot_dimension_numbers<[1], [0], [0], [1], [0, 0, 1, 1], [], []>} : vector<8x8xbf16>, vector<8x8xbf16>, vector<8x8xf32> -> vector<8x8xf32>
    %cst_23 = arith.constant 1.000000e+00 : f32
    %59 = vector.broadcast %cst_23 : f32 to vector<8x1xf32>
    %60 = arith.divf %59, %56 : vector<8x1xf32>
    %61 = vector.broadcast %60 : vector<8x1xf32> to vector<8x8xf32>
    %62 = arith.mulf %58, %61 : vector<8x8xf32>
    %63 = arith.truncf %62 : vector<8x8xf32> to vector<8x8xbf16>
    %c0_24 = arith.constant 0 : index
    %c16 = arith.constant 16 : index
    %64 = vector.load %arg7[%c0_24, %c16] : memref<8x32xbf16, #tpu.memory_space<vmem>>, vector<8x8xbf16>
    tpu.vector_store %arg7[%c0_24, %c16], %63 {strides = array<i32>} : memref<8x32xbf16, #tpu.memory_space<vmem>>, vector<8x8xbf16>,
    %65 = vector.extract_strided_slice %7 {offsets = [0, 24], sizes = [8, 8], strides = [1, 1]} : vector<8x96xbf16> to vector<8x8xbf16>
    %66 = vector.extract_strided_slice %7 {offsets = [0, 56], sizes = [8, 8], strides = [1, 1]} : vector<8x96xbf16> to vector<8x8xbf16>
    %67 = vector.extract_strided_slice %7 {offsets = [0, 88], sizes = [8, 8], strides = [1, 1]} : vector<8x96xbf16> to vector<8x8xbf16>
    "tpu.trace_start"() <{level = 10 : i32, message = "qd,kd->qk"}> : () -> ()
    %cst_25 = arith.constant dense<0.000000e+00> : vector<8x8xf32>
    %68 = tpu.matmul %65, %66, %cst_25 {dimension_numbers = #tpu.dot_dimension_numbers<[1], [1], [0], [0], [0, 0, 1, 0], [], []>} : vector<8x8xbf16>, vector<8x8xbf16>, vector<8x8xf32> -> vector<8x8xf32>
    "tpu.trace_stop"() : () -> ()
    %cst_26 = arith.constant dense<0xFF800000> : vector<8xf32>
    %69 = vector.multi_reduction <maximumf>, %68, %cst_26 [1] : vector<8x8xf32> to vector<8xf32>
    %70 = vector.shape_cast %69 : vector<8xf32> to vector<8x1xf32>
    %71 = vector.broadcast %70 : vector<8x1xf32> to vector<8x8xf32>
    %72 = arith.subf %68, %71 : vector<8x8xf32>
    %73 = math.exp %72 : vector<8x8xf32>
    %cst_27 = arith.constant dense<0.000000e+00> : vector<8xf32>
    %74 = vector.multi_reduction <add>, %73, %cst_27 [1] : vector<8x8xf32> to vector<8xf32>
    %75 = vector.shape_cast %74 : vector<8xf32> to vector<8x1xf32>
    %76 = arith.truncf %73 : vector<8x8xf32> to vector<8x8xbf16>
    %cst_28 = arith.constant dense<0.000000e+00> : vector<8x8xf32>
    %77 = tpu.matmul %76, %67, %cst_28 {dimension_numbers = #tpu.dot_dimension_numbers<[1], [0], [0], [1], [0, 0, 1, 1], [], []>} : vector<8x8xbf16>, vector<8x8xbf16>, vector<8x8xf32> -> vector<8x8xf32>
    %cst_29 = arith.constant 1.000000e+00 : f32
    %78 = vector.broadcast %cst_29 : f32 to vector<8x1xf32>
    %79 = arith.divf %78, %75 : vector<8x1xf32>
    %80 = vector.broadcast %79 : vector<8x1xf32> to vector<8x8xf32>
    %81 = arith.mulf %77, %80 : vector<8x8xf32>
    %82 = arith.truncf %81 : vector<8x8xf32> to vector<8x8xbf16>
    %c0_30 = arith.constant 0 : index
    %c24 = arith.constant 24 : index
    %83 = vector.load %arg7[%c0_30, %c24] : memref<8x32xbf16, #tpu.memory_space<vmem>>, vector<8x8xbf16>
    tpu.vector_store %arg7[%c0_30, %c24], %82 {strides = array<i32>} : memref<8x32xbf16, #tpu.memory_space<vmem>>, vector<8x8xbf16>,
    %c0_31 = arith.constant 0 : index
    %c0_32 = arith.constant 0 : index
    %84 = vector.load %arg7[%c0_31, %c0_32] : memref<8x32xbf16, #tpu.memory_space<vmem>>, vector<8x32xbf16>
    %c0_33 = arith.constant 0 : index
    %c0_34 = arith.constant 0 : index
    %85 = vector.load %arg4[%c0_33, %c0_34] : memref<32x128xbf16, #tpu.memory_space<vmem>>, vector<32x128xbf16>
    %cst_35 = arith.constant dense<0.000000e+00> : vector<8x128xf32>
    %86 = tpu.matmul %84, %85, %cst_35 {dimension_numbers = #tpu.dot_dimension_numbers<[1], [0], [0], [1], [0, 0, 1, 1], [], []>} : vector<8x32xbf16>, vector<32x128xbf16>, vector<8x128xf32> -> vector<8x128xf32>
    %c0_36 = arith.constant 0 : index
    %c0_37 = arith.constant 0 : index
    %87 = vector.load %arg5[%c0_36, %c0_37] : memref<1x128xf32, #tpu.memory_space<vmem>>, vector<1x128xf32>
    %88 = vector.broadcast %87 : vector<1x128xf32> to vector<8x128xf32>
    %89 = arith.addf %86, %88 : vector<8x128xf32>
    %90 = arith.truncf %89 : vector<8x128xf32> to vector<8x128xbf16>
    %c0_38 = arith.constant 0 : index
    %c0_39 = arith.constant 0 : index
    %c0_40 = arith.constant 0 : index
    %91 = vector.load %arg6[%c0_38, %c0_39, %c0_40] : memref<1x8x128xbf16, #tpu.memory_space<vmem>>, vector<1x8x128xbf16>
    %92 = vector.shape_cast %91 : vector<1x8x128xbf16> to vector<8x128xbf16>
    %93 = vector.shape_cast %90 : vector<8x128xbf16> to vector<1x8x128xbf16>
    tpu.vector_store %arg6[%c0_38, %c0_39, %c0_40], %93 {strides = array<i32>} : memref<1x8x128xbf16, #tpu.memory_space<vmem>>, vector<1x8x128xbf16>,
    return
  }
  func.func @transform_0(%arg0: i32) -> (i32, i32, i32) {
    %c0_i32 = arith.constant 0 : i32
    %c0_i32_0 = arith.constant 0 : i32
    %c0_i32_1 = arith.constant 0 : i32
    return %arg0, %c0_i32, %c0_i32_0 : i32, i32, i32
  }
  func.func @transform_1(%arg0: i32) -> (i32, i32) {
    %c0_i32 = arith.constant 0 : i32
    %c0_i32_0 = arith.constant 0 : i32
    %c0_i32_1 = arith.constant 0 : i32
    return %c0_i32, %c0_i32_0 : i32, i32
  }
  func.func @transform_2(%arg0: i32) -> (i32, i32) {
    %c0_i32 = arith.constant 0 : i32
    %c0_i32_0 = arith.constant 0 : i32
    %c0_i32_1 = arith.constant 0 : i32
    return %c0_i32, %c0_i32_0 : i32, i32
  }
  func.func @transform_3(%arg0: i32) -> (i32, i32) {
    %c0_i32 = arith.constant 0 : i32
    %c0_i32_0 = arith.constant 0 : i32
    %c0_i32_1 = arith.constant 0 : i32
    return %c0_i32, %c0_i32_0 : i32, i32
  }
  func.func @transform_4(%arg0: i32) -> (i32, i32) {
    %c0_i32 = arith.constant 0 : i32
    %c0_i32_0 = arith.constant 0 : i32
    %c0_i32_1 = arith.constant 0 : i32
    return %c0_i32, %c0_i32_0 : i32, i32
  }
  func.func @transform_5(%arg0: i32) -> (i32, i32, i32) {
    %c0_i32 = arith.constant 0 : i32
    %c0_i32_0 = arith.constant 0 : i32
    %c0_i32_1 = arith.constant 0 : i32
    return %arg0, %c0_i32, %c0_i32_0 : i32, i32, i32
  }
}

</mosaic_0001>

<bundles_post_ra>
// kernel: tpu_custom_call.1
= control target key start
LH: loop header
LB: loop body
LE: loop exit
PB: predicated region body
PF: predicated region fallthrough
CT: control target
= control target key end

     0   :  { %10 = vsyncpa [#allocation4], 0  ;;  %s1676_s0 = inlined_call_operand.hbm [shape: bf16[2,8,32], index: 0, kind: input, shape index: {}]   ;;  %s1677_s1 = inlined_call_operand.hbm [shape: bf16[32,96], index: 1, kind: input, shape index: {}]   ;;  %s1678_s2 = inlined_call_operand.vmem [shape: f32[1,96], index: 2, kind: input, shape index: {}]   ;;  %s1679_s3 = inlined_call_operand.hbm [shape: bf16[32,128], index: 3, kind: input, shape index: {}]   ;;  %s1680_s4 = inlined_call_operand.vmem [shape: f32[1,128], index: 4, kind: input, shape index: {}]   ;;  %s1681_s5 = inlined_call_operand.hbm [shape: bf16[2,8,128], index: 5, kind: output, shape index: {}]  }
   0x1   :  { %12 = vsyncpa [#allocation4 + $0x1], 0 }
   0x2   :  { %13 = vsyncpa [#allocation7], 0 }
   0x3   :  { %14 = vsyncpa [#allocation5], 0 }
   0x4   :  { %16 = vsyncpa [#allocation5 + $0x1], 0  ;;  %s1417_s18 = smov 0   ;;  %s1419_s19 = smov 0  }
   0x5   :  { %s1421_s20 = smov 0   ;;  %s1423_s21 = smov 0  }
   0x6 LB: > { %s1438_s22 = sadd.s32 4294967295, %s1363_s21   ;;  %s986_s23 = sadd.s32 4294967294, %s1363_s21   ;;  %s1363_s21 = sphi %s1423_s21, %s1703_s21   ;;  %s1359_s20 = sphi %s1421_s20, %s1702_s20   ;;  %s1355_s19 = sphi %s1419_s19, %s1701_s19   ;;  %s1351_s18 = sphi %s1417_s18, %s1700_s18  }
   0x7   : > { %p42_p0 = scmp.ne.s32.totalorder %s1355_s19, %s1351_s18  ;;  %p1682_p1 = scmp.eq.s32.totalorder %s1438_s22, 0 }
   0x8   : > { %p156_p3 = scmp.eq.s32.totalorder %s986_s23, 1  ;;  %p987_p5 = scmp.ge.s32.totalorder %s1363_s21, 1 }
   0x9   : > { %p1447_p4 = por %p1682_p1, %p42_p0  ;;  %p163_p7 = scmp.lt.s32.totalorder %s1363_s21, 3 }
   0xa   : > { %p1452_p6 = por %p156_p3, %p42_p0  ;;  %s1365_s27 = smov [#allocation6]  }
   0xb   : > { %s1686_s24 = scalar_select %p1447_p4, 1, 0 }
   0xc   : > { %s1687_s25 = scalar_select %p1452_p6, 1, 0 }
   0xd   : > { %p1457_p8 = pnand %p987_p5, %p163_p7  ;;  %s175_s28 = sshll.u32 %s1365_s27, 4  ;;  %s176_s28 = int_to_ptr.vmem [resolvable:$true] %s175_s28 }
   0xe   : > { %s1366_s30 = smov [#allocation8]   ;;  %s1226_s7 = scalar_lea.vmem %s176_s28, 256 }
   0xf   : > { %s1688_s26 = scalar_select %p1457_p8, 1, 0 }
  0x10   : > { %p1122_p9 = pneg %p1457_p8  ;;  %s191_s6 = sshll.u32 %s1366_s30, 4  ;;  %s192_s6 = int_to_ptr.vmem [resolvable:$true] %s191_s6 }
  0x11   : > { %p1227_p13 = scmp.ne.s32.totalorder %s176_s28, %s1226_s7  ;;  %p1234_p5 = scmp.lt.s32.totalorder %s176_s28, %s176_s28 }
  0x12   : > { %p1466_p11 = pnand %p1122_p9, %p1682_p1  ;;  %p1235_p7 = scmp.lt.s32.totalorder %s1226_s7, %s1226_s7 }
  0x14   : > { %p1217_p12 = pneg %p1466_p11  ;;  %p1236_p10 = por %p1235_p7, %p1234_p5 }
  0x16   : > { %p1229_p0 = pnand %p1227_p13, %p1217_p12 }
  0x18   : > { %p1230_p3 = pneg %p1229_p0 }
  0x1a   : > { %p1237_p9 = pnand %p1236_p10, %p1230_p3 }
  0x1c   : > { %1240 = shalt.err (!%p1237_p9)
}
  0x1d   : > { %s1367_s8 = smov 64   ;;  %s1368_s9 = smov 4  }
  0x1e   : > { %1125 = dma.hbm_to_vmem [thread:$0]  (!%p1466_p11), %s1677_s1, 256, %s176_s28, [#allocation7], %s1367_s8, %s1367_s8, %s1368_s9  }
  0x1f   : > { %s1252_s12 = scalar_lea.vmem %s192_s6, 256  ;;  %p1260_p2 = scmp.lt.s32.totalorder %s192_s6, %s192_s6 }
  0x20   : > { %p1253_p1 = scmp.ne.s32.totalorder %s192_s6, %s1252_s12  ;;  %p1261_p6 = scmp.lt.s32.totalorder %s1252_s12, %s1252_s12 }
  0x22   : > { %p1255_p13 = pnand %p1253_p1, %p1217_p12  ;;  %p1262_p5 = por %p1261_p6, %p1260_p2 }
  0x24   : > { %p1256_p0 = pneg %p1255_p13 }
  0x26   : > { %p1263_p10 = pnand %p1262_p5, %p1256_p0 }
  0x28   : > { %1266 = shalt.err (!%p1263_p10)
}
  0x29   : > { %1128 = dma.hbm_to_vmem [thread:$0]  (!%p1466_p11), %s1679_s3, 256, %s192_s6, [#allocation7], %s1367_s8, %s1367_s8, %s1368_s9  }
  0x2a   : > { %s1489_s15 = sadd.s32 1, %s1363_s21   ;;  %s29_s16 = sadd.s32 1, %s1359_s20 }
  0x2b   : > { %s26_s17 = ssub.s32 %s1363_s21, %s1489_s15  ;;  %p36_p1 = scmp.ne.s32.totalorder %s1359_s20, %s1355_s19 }
  0x2c   : > { %p27_p2 = scmp.eq.s32.totalorder %s26_s17, 0  ;;  %p37_p6 = scmp.eq.s32.totalorder %s1363_s21, 0 }
  0x2d   : > { %p1690_p12 = scmp.eq.s32.totalorder %s1438_s22, 1  ;;  %p1139_p7 = scmp.lt.s32.totalorder %s1363_s21, 2 }
  0x2e   : > { %s1505_s27 = scalar_select %p27_p2, %s1359_s20, %s29_s16  }
  0x2f   : > { %p1499_p3 = por %p1690_p12, %p36_p1  ;;  %p38_p9 = por %p37_p6, %p36_p1 }
  0x30   : > { %s208_s28 = sand.u32 1, %s1359_s20   ;;  %s992_s30 = sshll.u32 %s1363_s21, 6 }
  0x31   : > { %s1691_s23 = scalar_select %p1499_p3, 1, 0 }
  0x32   : > { %s991_s29 = sshll.u32 %s208_s28, 2  ;;  %s1512_s8 = scalar_lea.hbm %s1676_s0, %s992_s30 }
  0x33   : > { %s212_s9 = scalar_lea.vmem [#allocation3], %s991_s29  ;;  %p1514_p11 = pnand %p1139_p7, %p38_p9 }
  0x34   : > { %s219_s10 = sshll.u32 %s212_s9, 4  ;;  %s209_s12 = scalar_lea.sflag [#allocation4], %s208_s28  ;;  %s220_s10 = int_to_ptr.vmem [resolvable:$true] %s219_s10 }
  0x35   : > { %s1267_s13 = scalar_lea.hbm %s1512_s8, 64  ;;  %p1269_p0 = pneg %p1514_p11 }
  0x36   : > { %p1268_p13 = scmp.ne.s32.totalorder %s1512_s8, %s1267_s13  ;;  %s1272_s17 = scalar_lea.hbm %s1676_s0, 128 }
  0x37   : > { %p1273_p1 = scmp.lt.s32.totalorder %s1512_s8, %s1676_s0  ;;  %p1274_p2 = scmp.lt.s32.totalorder %s1272_s17, %s1267_s13 }
  0x38   : > { %p1270_p5 = pnand %p1269_p0, %p1268_p13 }
  0x39   : > { %p1275_p6 = por %p1274_p2, %p1273_p1 }
  0x3a   : > { %p1271_p10 = pneg %p1270_p5 }
  0x3c   : > { %p1276_p12 = pnand %p1275_p6, %p1271_p10 }
  0x3e   : > { %1279 = shalt.err (!%p1276_p12)
}
  0x3f   : > { %s1280_s6 = scalar_lea.vmem %s220_s10, 64  ;;  %s1369_s28 = smov [#allocation3]  }
  0x40   : > { %p1281_p7 = scmp.ne.s32.totalorder %s220_s10, %s1280_s6  ;;  %s1285_s7 = sshll.u32 %s1369_s28, 4  ;;  %s1286_s7 = int_to_ptr.vmem [resolvable:$false] %s1285_s7 }
  0x41   : > { %s1287_s9 = scalar_lea.vmem %s1286_s7, 128  ;;  %p1288_p13 = scmp.lt.s32.totalorder %s220_s10, %s1286_s7 }
  0x42   : > { %p1283_p9 = pnand %p1281_p7, %p1269_p0  ;;  %p1289_p5 = scmp.lt.s32.totalorder %s1287_s9, %s1280_s6 }
  0x44   : > { %p1284_p3 = pneg %p1283_p9  ;;  %p1290_p4 = por %p1289_p5, %p1288_p13 }
  0x46   : > { %p1291_p8 = pnand %p1290_p4, %p1284_p3 }
  0x48   : > { %1294 = shalt.err (!%p1291_p8)
}
  0x49   : > { %1132 = dma.hbm_to_vmem [thread:$0]  (!%p1514_p11), %s1512_s8, 64, %s220_s10, %s209_s12  }
  0x4a   : > { %p1693_p10 = scmp.ne.s32.totalorder %s1688_s26, 0 }
  0x4b   : > { %s1535_s13 = sand.u32 (!%p1693_p10), 1, %s1355_s19   ;;  %p1694_p4 = scmp.ne.s32.totalorder (!%p1693_p10), %s1686_s24, 0 }
  0x4c   : > { %228 = sbr.rel (%p1693_p10) target bundleno = 1351 (0x547), region = 40  ;;  %s994_s14 = sshll.u32 (!%p1693_p10), %s1535_s13, 2 }
  0x4d   : > { %s231_s16 = scalar_lea.sflag (!%p1693_p10), [#allocation4], %s1535_s13  ;;  %s234_s17 = scalar_lea.vmem (!%p1693_p10), [#allocation3], %s994_s14 }
  0x51   : > { %1338 = dma.done.wait (%p1694_p4), %s231_s16, 64  }
  0x52   : > { %1340 = vsyncadd (%p1694_p4), %s231_s16, 4294967232  ;;  %p1695_p8 = scmp.eq.s32.totalorder %s1438_s22, 0 }
  0x54   : > { %1342 = dma.done.wait (%p1695_p8), [#allocation7], 512   ;;  %p1696_p3 = pmov %p1695_p8 }
  0x55   : > { %v1370_v0 = vmov 0.0   ;;  %vm1371_vm0 = vmmov 0   ;;  %v1195_v1 = vld [vmem:[#allocation6 + $0x8] sm:$0xff]   ;;  %v1196_v2 = vld [vmem:[#allocation6] sm:$0xff]   ;;  %v270_v3 = vld [vmem:[%s234_s17] sm:$0xf] }
  0x56   : > { %1344 = vsyncadd (%p1696_p3), [#allocation7], 4294966784  ;;  %1046 = vmatprep.subr.bf16.mxu0 %v1370_v0  ;;  %1050 = vmatprep.mubr.msk.bf16.mxu0 %vm1371_vm0, %v1370_v0  ;;  %vm294_vm1 = vcmask 261120   ;;  %v998_v4 = vld [vmem:[%s1678_s2] ss:$0 sm:$0xff]  ;;  %s1372_s8 = smov 120  }
  0x57   : > { %1054 = vmatprep.subr.bf16.mxu1 %v1370_v0  ;;  %1056 = vmatprep.mubr.msk.bf16.mxu1 %vm1371_vm0, %v1370_v0  ;;  %s1373_s10 = smov 96   ;;  %s1374_s11 = smov 80   ;;  %vm342_vm2 = vcmask 64512   ;;  %vm404_vm3 = vcmask 1043456   ;;  %vm452_vm4 = vcmask 60416   ;;  %vm572_vm5 = vcmask 126016  }
  0x58   : > { %1047 = vmatpush3.bf16.msra.mxu0 %v1195_v1  ;;  %s1375_s12 = smov 88   ;;  %s1376_s30 = smov 72   ;;  %vm692_vm6 = vcmask 191616   ;;  %vm812_vm7 = vcmask 257216  }
  0x59   : > { %1048 = vmatprep.subr.bf16.mxu0 %v1370_v0  ;;  %s1377_s29 = smov 112   ;;  %s1378_s6 = smov 104  }
  0x5a   : > { %s1379_s28 = smov 56   ;;  %s1380_s7 = smov 64  }
  0x5b   : > { %s1381_s9 = smov 40   ;;  %s1382_s16 = smov 48  }
  0x5c   : > { %1049 = vmatpush3.bf16.msra.mxu0 %v1196_v2  ;;  %s1383_s17 = smov 8   ;;  %s1384_s24 = smov 16  }
  0x5d   : > { %1060 = vmatprep.subr.bf16.mxu0 %v1370_v0  ;;  %s1385_s26 = smov 24   ;;  %p1697_p0 = scmp.ne.s32.totalorder %s1691_s23, 0 }
  0x5f   : > { %1051 = vmatmul.mubr.msk.bf16.vlgmr.msra.gmra.mxu0 %vm294_vm1, %v270_v3 }
  0x60   : > { %1062 = vmatprep.mubr.msk.bf16.mxu0 %vm1371_vm0, %v1370_v0 }
 0x11f   : > { %v332_v5 = vpop.f32.mrf.mxu0 }
 0x120   : > { %v333_v6 = vadd.f32 %v998_v4, %v332_v5 }
 0x121   : > { %v1052_v7 = vpop.f32.mrf.mxu0 }
 0x122   : > { %v1563_v8 = vpack.c.bf16 %v333_v6, %v333_v6 }
 0x123   : > { %v335_v9 = vpop.f32.mrf.mxu0 }
 0x124   : > { %454 = vrot.lane.b32.xlu1 %v1563_v8, %s1372_s8  ;;  %340 = vrot.lane.b32.xlu0 %v1563_v8, %s1373_s10 }
 0x125   : > { %v1053_v10 = vpop.f32.mrf.mxu0 }
 0x128   : > { %576 = vrot.lane.b32.xlu1 %v1563_v8, %s1374_s11  ;;  %456 = vrot.lane.b32.xlu0 %v1563_v8, %s1375_s12  ;;  %s1018_s11 = sshll.u32 %s1438_s22, 6  ;;  %s268_s12 = scalar_lea.vmem [#allocation9], %s994_s14 }
 0x129   : > { %s884_s22 = scalar_lea.sflag [#allocation5], %s1535_s13  ;;  %s1386_s14 = smov [#allocation9]  }
 0x12c   : > { %696 = vrot.lane.b32.xlu1 %v1563_v8, %s1376_s30  ;;  %574 = vrot.lane.b32.xlu0 %v1563_v8, %s1377_s29  ;;  %s897_s30 = sshll.u32 %s268_s12, 4  ;;  %s1635_s30 = int_to_ptr.vmem [resolvable:$true] %s897_s30 }
 0x130   : > { %694 = vrot.lane.b32.xlu0 %v1563_v8, %s1378_s6 }
 0x196   : > { %v341_v11 = vpop.permute.xlu0 %340  ;;  %v455_v14 = vpop.permute.xlu1 %454 }
 0x197   : > { %v347_v12 = vsel %vm342_vm2, %v341_v11, 0 }
 0x198   : > { %1055 = vmatpush3.bf16.xpose.msra.mxu1 %v347_v12 }
 0x199   : > { %1066 = vmatprep.subr.bf16.mxu1 %v1370_v0 }
 0x19a   : > { %v457_v13 = vpop.permute.xlu0 %456  ;;  %v577_v16 = vpop.permute.xlu1 %576 }
 0x19b   : > { %v462_v15 = vsel %vm342_vm2, %v457_v13, 0  ;;  %v582_v17 = vsel %vm342_vm2, %v577_v16, 0 }
 0x19e   : > { %v697_v18 = vpop.permute.xlu1 %696  ;;  %v575_v19 = vpop.permute.xlu0 %574 }
 0x19f   : > { %1057 = vmatmul.mubr.msk.bf16.vlgmr.msra.gmra.mxu1 %vm342_vm2, %v1563_v8  ;;  %v702_v20 = vsel %vm342_vm2, %v697_v18, 0 }
 0x1a0   : > { %1067 = vmatpush3.bf16.xpose.msra.mxu1 %v462_v15  ;;  %1068 = vmatprep.mubr.msk.bf16.mxu1 %vm1371_vm0, %v1370_v0 }
 0x1a1   : > { %1078 = vmatprep.subr.bf16.mxu1 %v1370_v0 }
 0x1a2   : > { %v695_v21 = vpop.permute.xlu0 %694 }
 0x1a7   : > { %1069 = vmatmul.mubr.msk.bf16.vlgmr.msra.gmra.mxu1 %vm342_vm2, %v455_v14 }
 0x1a8   : > { %1079 = vmatpush3.bf16.xpose.msra.mxu1 %v582_v17  ;;  %1080 = vmatprep.mubr.msk.bf16.mxu1 %vm1371_vm0, %v1370_v0 }
 0x1a9   : > { %1090 = vmatprep.subr.bf16.mxu1 %v1370_v0 }
 0x1af   : > { %1081 = vmatmul.mubr.msk.bf16.vlgmr.msra.gmra.mxu1 %vm342_vm2, %v575_v19 }
 0x1b0   : > { %1091 = vmatpush3.bf16.xpose.msra.mxu1 %v702_v20  ;;  %1092 = vmatprep.mubr.msk.bf16.mxu1 %vm1371_vm0, %v1370_v0 }
 0x1b1   : > { %1102 = vmatprep.subr.bf16.mxu1 %v1370_v0 }
 0x1b7   : > { %1093 = vmatmul.mubr.msk.bf16.vlgmr.msra.gmra.mxu1 %vm342_vm2, %v695_v21 }
 0x1b8   : > { %1106 = vmatprep.mubr.msk.bf16.mxu1 %vm1371_vm0, %v1370_v0 }
 0x25f   : > { %v383_v22 = vpop.f32.mrf.mxu1 }
 0x260   : > { %v389_v23 = vsel %vm342_vm2, %v383_v22, -inf }
 0x261   : > { %390 = vmax.xlane.f32.xlu1 %v389_v23  ;;  %v1058_v24 = vpop.f32.mrf.mxu1 }
 0x263   : > { %v386_v25 = vpop.f32.mrf.mxu1 }
 0x265   : > { %v1059_v26 = vpop.f32.mrf.mxu1 }
 0x267   : > { %v498_v27 = vpop.f32.mrf.mxu1 }
 0x268   : > { %v504_v28 = vsel %vm342_vm2, %v498_v27, -inf }
 0x269   : > { %505 = vmax.xlane.f32.xlu0 %v504_v28  ;;  %v1070_v29 = vpop.f32.mrf.mxu1 }
 0x26b   : > { %v501_v30 = vpop.f32.mrf.mxu1 }
 0x26d   : > { %v1071_v31 = vpop.f32.mrf.mxu1 }
 0x26f   : > { %v618_v32 = vpop.f32.mrf.mxu1 }
 0x270   : > { %v624_v33 = vsel %vm342_vm2, %v618_v32, -inf }
 0x271   : > { %625 = vmax.xlane.f32.xlu0 %v624_v33  ;;  %v1082_v34 = vpop.f32.mrf.mxu1 }
 0x272   : > { %514 = vrot.lane.b32.xlu1 %v1563_v8, %s1379_s28  ;;  %v1197_v34 = vld [vmem:[#allocation8 + $0x8] sm:$0xff]   ;;  %s1633_s28 = scalar_lea.hbm %s1681_s5, %s1018_s11 }
 0x273   : > { %v621_v35 = vpop.f32.mrf.mxu1  ;;  %1103 = vmatpush3.bf16.msra.mxu1 %v1197_v34 }
 0x274   : > { %1104 = vmatprep.subr.bf16.mxu1 %v1370_v0 }
 0x275   : > { %v1083_v36 = vpop.f32.mrf.mxu1 }
 0x276   : > { %v1198_v36 = vld [vmem:[#allocation8] sm:$0xff]  }
 0x277   : > { %v738_v37 = vpop.f32.mrf.mxu1  ;;  %1105 = vmatpush3.bf16.msra.mxu1 %v1198_v36 }
 0x278   : > { %v744_v41 = vsel %vm342_vm2, %v738_v37, -inf }
 0x279   : > { %v1094_v38 = vpop.f32.mrf.mxu1 }
 0x27b   : > { %v741_v39 = vpop.f32.mrf.mxu1 }
 0x27d   : > { %v1095_v40 = vpop.f32.mrf.mxu1 }
 0x287   : > { %399 = vrot.lane.b32.xlu0 %v1563_v8, %s1380_s7  ;;  %s1295_s7 = scalar_lea.vmem %s1635_s30, 64 }
 0x288   : > { %p1296_p11 = scmp.ne.s32.totalorder %s1635_s30, %s1295_s7 }
 0x28a   : > { %p1297_p1 = pnand %p1296_p11, %p1697_p0 }
 0x28b   : > { %754 = vrot.lane.b32.xlu0 %v1563_v8, %s1381_s9  ;;  %s1299_s9 = sshll.u32 %s1386_s14, 4  ;;  %s1300_s9 = int_to_ptr.vmem [resolvable:$false] %s1299_s9 }
 0x28c   : > { %p1298_p2 = pneg %p1297_p1  ;;  %p1302_p6 = scmp.lt.s32.totalorder %s1635_s30, %s1300_s9 }
 0x296   : > { %745 = vmax.xlane.f32.xlu1 %v744_v41 }
 0x2a7   : > { %634 = vrot.lane.b32.xlu1 %v1563_v8, %s1382_s16  ;;  %s1301_s16 = scalar_lea.vmem %s1300_s9, 128 }
 0x2a8   : > { %p1303_p12 = scmp.lt.s32.totalorder %s1301_s16, %s1295_s7 }
 0x2aa   : > { %p1304_p7 = por %p1303_p12, %p1302_p6 }
 0x2ac   : > { %p1305_p9 = pnand %p1304_p7, %p1298_p2 }
 0x2ea   : > { %v391_v42 = vpop.xlane.xlu1 %390 }
 0x2eb   : > { %v392_v43 = vsub.f32 %v383_v22, %v391_v42 }
 0x2ed   : > { %v393_v44 = vmul.f32 1.442695, %v392_v43 }
 0x2ee   : > { %v515_v54 = vpop.permute.xlu1 %514 }
 0x2ef   : > { %1199 = vpow2.f32 %v393_v44  ;;  %v520_v56 = vsel %vm404_vm3, %v515_v54, 0 }
 0x2f2   : > { %v506_v45 = vpop.xlane.xlu0 %505 }
 0x2f3   : > { %v507_v46 = vsub.f32 %v498_v27, %v506_v45 }
 0x2f5   : > { %v508_v47 = vmul.f32 1.442695, %v507_v46 }
 0x2f7   : > { %1201 = vpow2.f32 %v508_v47 }
 0x2fa   : > { %v626_v48 = vpop.xlane.xlu0 %625 }
 0x2fb   : > { %v627_v49 = vsub.f32 %v618_v32, %v626_v48  ;;  %v1013_v48 = vld [vmem:[%s1680_s4] ss:$0 sm:$0xff] }
 0x2fc   : > { %v1200_v51 = vpop.eup %1199 }
 0x2fd   : > { %v628_v50 = vmul.f32 1.442695, %v627_v49  ;;  %v398_v55 = vpack.c.bf16 %v1200_v51, %v1200_v51  ;;  %v395_v59 = vsel %vm342_vm2, %v1200_v51, 0.0 }
 0x2fe   : > { %v400_v52 = vpop.permute.xlu0 %399 }
 0x2ff   : > { %1203 = vpow2.f32 %v628_v50  ;;  %v406_v53 = vsel %vm404_vm3, %v400_v52, 0 }
 0x300   : > { %1061 = vmatpush3.bf16.msra.mxu0 %v406_v53 }
 0x301   : > { %1072 = vmatprep.subr.bf16.mxu0 %v1370_v0 }
 0x302   : > { %v755_v5 = vpop.permute.xlu0 %754 }
 0x303   : > { %1063 = vmatmul.mubr.msk.bf16.vlgmr.msra.gmra.mxu0 %vm342_vm2, %v398_v55  ;;  %v760_v7 = vsel %vm404_vm3, %v755_v5, 0 }
 0x304   : > { %v1202_v57 = vpop.eup %1201  ;;  %1073 = vmatpush3.bf16.msra.mxu0 %v520_v56  ;;  %1074 = vmatprep.mubr.msk.bf16.mxu0 %vm1371_vm0, %v1370_v0 }
 0x305   : > { %v510_v58 = vsel %vm342_vm2, %v1202_v57, 0.0  ;;  %1084 = vmatprep.subr.bf16.mxu0 %v1370_v0  ;;  %v513_v60 = vpack.c.bf16 %v1202_v57, %v1202_v57 }
 0x306   : > { %511 = vadd.xlane.f32.xlu1 %v510_v58 }
 0x30a   : > { %396 = vadd.xlane.f32.xlu1 %v395_v59 }
 0x30b   : > { %1075 = vmatmul.mubr.msk.bf16.vlgmr.msra.gmra.mxu0 %vm342_vm2, %v513_v60 }
 0x30c   : > { %v1204_v61 = vpop.eup %1203  ;;  %1086 = vmatprep.mubr.msk.bf16.mxu0 %vm1371_vm0, %v1370_v0 }
 0x30d   : > { %v630_v62 = vsel %vm342_vm2, %v1204_v61, 0.0  ;;  %v633_v6 = vpack.c.bf16 %v1204_v61, %v1204_v61 }
 0x30e   : > { %631 = vadd.xlane.f32.xlu0 %v630_v62 }
 0x31f   : > { %v746_v63 = vpop.xlane.xlu1 %745 }
 0x320   : > { %v747_v1 = vsub.f32 %v738_v37, %v746_v63 }
 0x322   : > { %v748_v2 = vmul.f32 1.442695, %v747_v1 }
 0x323   : > { %v635_v3 = vpop.permute.xlu1 %634 }
 0x324   : > { %1205 = vpow2.f32 %v748_v2  ;;  %v640_v4 = vsel %vm404_vm3, %v635_v3, 0 }
 0x325   : > { %1085 = vmatpush3.bf16.msra.mxu0 %v640_v4 }
 0x326   : > { %1096 = vmatprep.subr.bf16.mxu0 %v1370_v0 }
 0x328   : > { %1087 = vmatmul.mubr.msk.bf16.vlgmr.msra.gmra.mxu0 %vm342_vm2, %v633_v6 }
 0x329   : > { %1097 = vmatpush3.bf16.msra.mxu0 %v760_v7  ;;  %1098 = vmatprep.mubr.msk.bf16.mxu0 %vm1371_vm0, %v1370_v0 }
 0x331   : > { %v1206_v8 = vpop.eup %1205 }
 0x332   : > { %v750_v9 = vsel %vm342_vm2, %v1206_v8, 0.0  ;;  %v753_v10 = vpack.c.bf16 %v1206_v8, %v1206_v8 }
 0x333   : > { %751 = vadd.xlane.f32.xlu0 %v750_v9 }
 0x334   : > { %1099 = vmatmul.mubr.msk.bf16.vlgmr.msra.gmra.mxu0 %vm342_vm2, %v753_v10 }
 0x38f   : > { %v512_v11 = vpop.xlane.xlu1 %511 }
 0x393   : > { %v397_v12 = vpop.xlane.xlu1 %396 }
 0x394   : > { %1207 = vrcp.f32 %v397_v12 }
 0x395   : > { %1209 = vrcp.f32 %v512_v11 }
 0x397   : > { %v632_v27 = vpop.xlane.xlu0 %631 }
 0x398   : > { %1211 = vrcp.f32 %v632_v27 }
 0x3a1   : > { %v1208_v13 = vpop.eup %1207 }
 0x3a2   : > { %v1210_v20 = vpop.eup %1209 }
 0x3a5   : > { %v1212_v29 = vpop.eup %1211 }
 0x3bc   : > { %v752_v28 = vpop.xlane.xlu0 %751 }
 0x3bd   : > { %1213 = vrcp.f32 %v752_v28 }
 0x3c3   : > { %v442_v14 = vpop.f32.mrf.mxu0 }
 0x3c4   : > { %v450_v15 = vmul.f32 %v1208_v13, %v442_v14 }
 0x3c5   : > { %v1064_v16 = vpop.f32.mrf.mxu0 }
 0x3c6   : > { %v451_v17 = vpack.c.bf16 %v450_v15, %v450_v15 }
 0x3c7   : > { %v445_v18 = vpop.f32.mrf.mxu0 }
 0x3c8   : > { %453 = vst.msk [vmem:[#allocation2] sm:$0xf] %vm452_vm4, %v451_v17 }
 0x3c9   : > { %v1065_v19 = vpop.f32.mrf.mxu0 }
 0x3ca   : > { %v1214_v38 = vpop.eup %1213 }
 0x3cb   : > { %v556_v21 = vpop.f32.mrf.mxu0 }
 0x3cc   : > { %v564_v22 = vmul.f32 %v1210_v20, %v556_v21 }
 0x3cd   : > { %v1076_v23 = vpop.f32.mrf.mxu0 }
 0x3ce   : > { %v1021_v24 = vpack.c.bf16 %v564_v22, %v564_v22 }
 0x3cf   : > { %v559_v25 = vpop.f32.mrf.mxu0 }
 0x3d0   : > { %569 = vrot.lane.b32.xlu0 %v1021_v24, %s1383_s17 }
 0x3d1   : > { %v1077_v26 = vpop.f32.mrf.mxu0 }
 0x3e8   : > { %v676_v30 = vpop.f32.mrf.mxu0 }
 0x3e9   : > { %v684_v31 = vmul.f32 %v1212_v29, %v676_v30 }
 0x3ea   : > { %v1088_v32 = vpop.f32.mrf.mxu0 }
 0x3eb   : > { %v1022_v33 = vpack.c.bf16 %v684_v31, %v684_v31 }
 0x3ec   : > { %v679_v35 = vpop.f32.mrf.mxu0 }
 0x3ed   : > { %689 = vrot.lane.b32.xlu1 %v1022_v33, %s1384_s24 }
 0x3ee   : > { %v1089_v37 = vpop.f32.mrf.mxu0 }
 0x3f4   : > { %v796_v39 = vpop.f32.mrf.mxu0 }
 0x3f5   : > { %v804_v40 = vmul.f32 %v1214_v38, %v796_v39 }
 0x3f6   : > { %v1100_v41 = vpop.f32.mrf.mxu0 }
 0x3f7   : > { %v1023_v42 = vpack.c.bf16 %v804_v40, %v804_v40 }
 0x3f8   : > { %v799_v43 = vpop.f32.mrf.mxu0 }
 0x3f9   : > { %809 = vrot.lane.b32.xlu1 %v1023_v42, %s1385_s26 }
 0x3fa   : > { %v1101_v44 = vpop.f32.mrf.mxu0 }
 0x442   : > { %v570_v45 = vpop.permute.xlu0 %569 }
 0x443   : > { %573 = vst.msk [vmem:[#allocation2] sm:$0xf] %vm572_vm5, %v570_v45 }
 0x45f   : > { %v690_v46 = vpop.permute.xlu1 %689 }
 0x460   : > { %693 = vst.msk [vmem:[#allocation2] sm:$0xf] %vm692_vm6, %v690_v46 }
 0x46b   : > { %v810_v0 = vpop.permute.xlu1 %809 }
 0x46c   : > { %813 = vst.msk [vmem:[#allocation2] sm:$0xf] %vm812_vm7, %v810_v0 }
 0x473   : > { %v814_v47 = vld [vmem:[#allocation2] sm:$0xf] }
 0x474   : > { %1107 = vmatmul.mubr.msk.bf16.vlgmr.msra.gmra.mxu1 %vm294_vm1, %v814_v47 }
 0x534   : > { %v875_v49 = vpop.f32.mrf.mxu1 }
 0x535   : > { %v876_v50 = vadd.f32 %v1013_v48, %v875_v49 }
 0x536   : > { %v1108_v51 = vpop.f32.mrf.mxu1 }
 0x537   : > { %v881_v52 = vpack.c.bf16 %v876_v50, %v876_v50 }
 0x538   : > { %v878_v53 = vpop.f32.mrf.mxu1 }
 0x539   : > { %882 = vst [vmem:[%s268_s12] sm:$0xf] %v881_v52 }
 0x53a   : > { %v1109_v54 = vpop.f32.mrf.mxu1 }
 0x53b   : > { %1308 = shalt.err (!%p1305_p9)
}
 0x53c   : > { %s1309_s17 = scalar_lea.hbm %s1633_s28, 64  ;;  %s1313_s26 = scalar_lea.hbm %s1681_s5, 128 }
 0x53d   : > { %p1310_p13 = scmp.ne.s32.totalorder %s1633_s28, %s1309_s17  ;;  %p1314_p4 = scmp.lt.s32.totalorder %s1633_s28, %s1681_s5 }
 0x53e   : > { %p1315_p8 = scmp.lt.s32.totalorder %s1313_s26, %s1309_s17 }
 0x53f   : > { %p1311_p5 = pnand %p1310_p13, %p1697_p0 }
 0x540   : > { %p1316_p3 = por %p1315_p8, %p1314_p4 }
 0x541   : > { %p1312_p10 = pneg %p1311_p5 }
 0x543   : > { %p1317_p11 = pnand %p1316_p3, %p1312_p10 }
 0x545   : > { %1320 = shalt.err (!%p1317_p11)
}
 0x546   : > { %1120 = dma.vmem_to_hbm [thread:$0]  (%p1697_p0), %s1635_s30, 64, %s1633_s28, %s884_s22  }
 0x547 PF: > { %s909_s11 = sand.u32 1, %s1351_s18   ;;  %p1698_p1 = scmp.ne.s32.totalorder %s1687_s25, 0 }
 0x548   : > { %p1699_p2 = scmp.ge.s32.totalorder %s1363_s21, 2  ;;  %s910_s12 = scalar_lea.sflag [#allocation5], %s909_s11 }
 0x54a   : > { %p1134_p6 = pnand %p1699_p2, %p1698_p1 }
 0x54c   : > { %p1135_p12 = pneg %p1134_p6 }
 0x54e   : > { %1346 = dma.done.wait (%p1135_p12), %s910_s12, 64  }
 0x54f   : > { %1348 = vsyncadd (%p1135_p12), %s910_s12, 4294967232  ;;  %p19_p7 = scmp.ge.s32.totalorder %s1489_s15, 4   ;;  %s1700_s18 = smov %s1355_s19 }
 0x550   : > { %s1701_s19 = smov %s1359_s20  ;;  %s1702_s20 = smov %s1505_s27 }
 0x551   : > { %s1703_s21 = smov %s1489_s15  ;;  %21 = sbr.rel (!%p19_p7) target bundleno = 6 (0x6), region = 93 }
 0x556   :  { %915 = vsyncpa [#allocation4], 1 }
 0x557   :  { %917 = vsyncpa [#allocation4 + $0x1], 1 }
 0x558   :  { %918 = vsyncpa [#allocation7], 1 }
 0x559   :  { %919 = vsyncpa [#allocation5], 1 }
 0x55a   :  { %921 = vsyncpa [#allocation5 + $0x1], 1 }

</bundles_post_ra>
